<compile_context>
chip_gen: v7x
topology: tpu7x:2x2x1
jax: 0.10.0
libtpu: 0.0.40
codegen_flags: <defaults>
</compile_context>

<pallas_src>
import functools

import jax
import jax.numpy as jnp
from jax.experimental import pallas as pl
from jax.experimental.pallas import tpu as pltpu

BN_EPS = 1e-5
LANE = 128


def _round_up(n, m):
    return ((n + m - 1) // m) * m


def _pick_batch_tile(batch, min_sublane, cap):
    """Largest divisor of `batch` that is a multiple of `min_sublane` and <= cap."""
    t = min(cap, batch)
    t -= t % min_sublane
    while t >= min_sublane:
        if batch % t == 0:
            return t
        t -= min_sublane
    return batch  # full-array block is always legal


def _pad2d(a, rows, cols):
    r, c = a.shape
    if (r, c) == (rows, cols):
        return a
    return jnp.pad(a, ((0, rows - r), (0, cols - c)))


def _vmem_capacity_bytes():
    try:
        return int(pltpu.get_tpu_info().vmem_capacity_bytes)
    except Exception:
        return 64 << 20  # conservative fallback: v7x per-TensorCore VMEM


def _vmem_limit(estimate_bytes, capacity):
    lim = int(1.5 * estimate_bytes) + (4 << 20)
    lim = max(lim, 32 << 20)
    return min(lim, int(0.9 * capacity))


# --------------------------------------------------------------------------
# Parameter preparation (done ONCE, outside the training step)
# --------------------------------------------------------------------------
def prepare_params(w1_t, gamma1, beta1, w2_t, gamma2, beta2, *, mxu_dtype=jnp.bfloat16):
    """Pad feature dims to multiples of 128 lanes and cast matmul weights to the
    MXU dtype once.  w1_t: (in, hidden), w2_t: (hidden, out) (pre-transposed)."""
    in_f, hid_f = w1_t.shape
    out_f = w2_t.shape[1]
    in_p, hid_p, out_p = (_round_up(d, LANE) for d in (in_f, hid_f, out_f))

    w1p = _pad2d(w1_t, in_p, hid_p).astype(mxu_dtype)
    w2p = _pad2d(w2_t, hid_p, out_p).astype(mxu_dtype)
    g1p = _pad2d(jnp.asarray(gamma1, jnp.float32).reshape(1, -1), 1, hid_p)
    b1p = _pad2d(jnp.asarray(beta1, jnp.float32).reshape(1, -1), 1, hid_p)
    g2p = _pad2d(jnp.asarray(gamma2, jnp.float32).reshape(1, -1), 1, out_p)
    b2p = _pad2d(jnp.asarray(beta2, jnp.float32).reshape(1, -1), 1, out_p)
    return dict(w1=w1p, g1=g1p, b1=b1p, w2=w2p, g2=g2p, b2=b2p,
                dims=(in_f, hid_f, out_f), mxu_dtype=mxu_dtype)


# --------------------------------------------------------------------------
# Fully fused kernel: phases (0: l2norm+mm1, 1: BN1+ReLU+mm2, 2: BN2) x batch tiles
# h and z stay resident in VMEM scratch for the whole call.
# --------------------------------------------------------------------------
def _fused_head_kernel(x_ref, w1_ref, g1_ref, b1_ref, w2_ref, g2_ref, b2_ref,
                       o_ref, h_scr, z_scr, s1, q1, s2, q2,
                       *, tb, inv_batch, mxu_dtype):
    p = pl.program_id(0)
    i = pl.program_id(1)
    row0 = pl.multiple_of(i * tb, tb)

    @pl.when((p == 0) & (i == 0))
    def _init():
        s1[...] = jnp.zeros_like(s1)
        q1[...] = jnp.zeros_like(q1)
        s2[...] = jnp.zeros_like(s2)
        q2[...] = jnp.zeros_like(q2)

    # ---- phase 0: row-wise L2 norm + Linear1 -> h_scr, BN1 sum/sumsq ----
    @pl.when(p == 0)
    def _phase0():
        x = x_ref[...].astype(jnp.float32)
        inv_norm = jax.lax.rsqrt(jnp.sum(x * x, axis=1, keepdims=True))
        xn = (x * inv_norm).astype(mxu_dtype)
        h = jnp.dot(xn, w1_ref[...], preferred_element_type=jnp.float32)
        hs = h.astype(h_scr.dtype)
        h_scr[pl.ds(row0, tb), :] = hs
        hf = hs.astype(jnp.float32)              # stats from the stored (rounded) values
        s1[...] += jnp.sum(hf, axis=0, keepdims=True)
        q1[...] += jnp.sum(hf * hf, axis=0, keepdims=True)

    # ---- phase 1: fold BN1 once, then BN1+ReLU+Linear2 -> z_scr, BN2 stats ----
    @pl.when((p == 1) & (i == 0))
    def _fold_bn1():
        mean = s1[...] * inv_batch
        var = jnp.maximum(q1[...] * inv_batch - mean * mean, 0.0)
        scale = g1_ref[...] * jax.lax.rsqrt(var + BN_EPS)
        s1[...] = scale                          # reuse stats scratch for the fold
        q1[...] = b1_ref[...] - mean * scale

    @pl.when(p == 1)
    def _phase1():
        h = h_scr[pl.ds(row0, tb), :].astype(jnp.float32)
        a = jnp.maximum(h * s1[...] + q1[...], 0.0).astype(mxu_dtype)
        z = jnp.dot(a, w2_ref[...], preferred_element_type=jnp.float32)
        zs = z.astype(z_scr.dtype)
        z_scr[pl.ds(row0, tb), :] = zs
        zf = zs.astype(jnp.float32)
        s2[...] += jnp.sum(zf, axis=0, keepdims=True)
        q2[...] += jnp.sum(zf * zf, axis=0, keepdims=True)

    # ---- phase 2: fold BN2 once, apply scale/shift, write output ----
    @pl.when((p == 2) & (i == 0))
    def _fold_bn2():
        mean = s2[...] * inv_batch
        var = jnp.maximum(q2[...] * inv_batch - mean * mean, 0.0)
        scale = g2_ref[...] * jax.lax.rsqrt(var + BN_EPS)
        s2[...] = scale
        q2[...] = b2_ref[...] - mean * scale

    @pl.when(p == 2)
    def _phase2():
        z = z_scr[pl.ds(row0, tb), :].astype(jnp.float32)
        o_ref[...] = (z * s2[...] + q2[...]).astype(o_ref.dtype)


# --------------------------------------------------------------------------
# Split fallback (large batch): stage 1 streams h through HBM, then a fused
# stage 2+3 keeps only z (B x out_pad) resident in VMEM.
# --------------------------------------------------------------------------
def _stage1_kernel(x_ref, w1_ref, h_ref, s1_ref, q1_ref, *, mxu_dtype):
    @pl.when(pl.program_id(0) == 0)
    def _init():
        s1_ref[...] = jnp.zeros_like(s1_ref)
        q1_ref[...] = jnp.zeros_like(q1_ref)

    x = x_ref[...].astype(jnp.float32)
    inv_norm = jax.lax.rsqrt(jnp.sum(x * x, axis=1, keepdims=True))
    xn = (x * inv_norm).astype(mxu_dtype)
    h = jnp.dot(xn, w1_ref[...], preferred_element_type=jnp.float32)
    hs = h.astype(h_ref.dtype)
    h_ref[...] = hs
    hf = hs.astype(jnp.float32)
    s1_ref[...] += jnp.sum(hf, axis=0, keepdims=True)
    q1_ref[...] += jnp.sum(hf * hf, axis=0, keepdims=True)


def _stage23_kernel(h_ref, s1_ref, q1_ref, g1_ref, b1_ref, w2_ref, g2_ref, b2_ref,
                    o_ref, z_scr, sc1, sh1, s2, q2, *, tb, inv_batch, mxu_dtype):
    p = pl.program_id(0)
    i = pl.program_id(1)
    row0 = pl.multiple_of(i * tb, tb)

    @pl.when((p == 0) & (i == 0))
    def _fold_bn1():
        mean = s1_ref[...] * inv_batch
        var = jnp.maximum(q1_ref[...] * inv_batch - mean * mean, 0.0)
        scale = g1_ref[...] * jax.lax.rsqrt(var + BN_EPS)
        sc1[...] = scale
        sh1[...] = b1_ref[...] - mean * scale
        s2[...] = jnp.zeros_like(s2)
        q2[...] = jnp.zeros_like(q2)

    @pl.when(p == 0)
    def _phase0():
        h = h_ref[...].astype(jnp.float32)
        a = jnp.maximum(h * sc1[...] + sh1[...], 0.0).astype(mxu_dtype)
        z = jnp.dot(a, w2_ref[...], preferred_element_type=jnp.float32)
        zs = z.astype(z_scr.dtype)
        z_scr[pl.ds(row0, tb), :] = zs
        zf = zs.astype(jnp.float32)
        s2[...] += jnp.sum(zf, axis=0, keepdims=True)
        q2[...] += jnp.sum(zf * zf, axis=0, keepdims=True)

    @pl.when((p == 1) & (i == 0))
    def _fold_bn2():
        mean = s2[...] * inv_batch
        var = jnp.maximum(q2[...] * inv_batch - mean * mean, 0.0)
        scale = g2_ref[...] * jax.lax.rsqrt(var + BN_EPS)
        s2[...] = scale
        q2[...] = b2_ref[...] - mean * scale

    @pl.when(p == 1)
    def _phase1():
        z = z_scr[pl.ds(row0, tb), :].astype(jnp.float32)
        o_ref[...] = (z * s2[...] + q2[...]).astype(o_ref.dtype)


# --------------------------------------------------------------------------
# Wrapper
# --------------------------------------------------------------------------
def projection_head_forward(x, params, *, max_batch_tile=256, force_split=False):
    """x: (B, in_features), native dtype.  `params` from prepare_params()."""
    in_f, hid_f, out_f = params["dims"]
    mxu_dtype = params["mxu_dtype"]
    w1p, g1p, b1p = params["w1"], params["g1"], params["b1"]
    w2p, g2p, b2p = params["w2"], params["g2"], params["b2"]

    B = x.shape[0]
    assert x.shape[1] == in_f
    in_pad, hid_pad = w1p.shape
    out_pad = w2p.shape[1]

    store_dtype = mxu_dtype                   # intermediates stored at MXU precision
    store_sz = jnp.dtype(store_dtype).itemsize
    x_sz = jnp.dtype(x.dtype).itemsize
    o_sz = x_sz
    msz = store_sz

    min_sublane = 16 if store_sz == 2 else 8
    tb = _pick_batch_tile(B, min_sublane, max_batch_tile)
    nb = B // tb
    inv_batch = 1.0 / B

    # Pad x columns only when needed; keep native dtype (cast happens in-kernel).
    xp = x if in_pad == in_f else jnp.pad(x, ((0, 0), (0, in_pad - in_f)))

    capacity = _vmem_capacity_bytes()
    resident = pl.BlockSpec(memory_space=pltpu.MemorySpace.VMEM)  # whole array, single copy

    small_bytes = 4 * 8 * (hid_pad + out_pad) * 4
    weight_bytes = (in_pad * hid_pad + hid_pad * out_pad) * msz + small_bytes
    fused_scratch = B * (hid_pad + out_pad) * store_sz + small_bytes
    fused_blocks = 2 * tb * (in_pad * x_sz + out_pad * o_sz)
    fused_est = weight_bytes + fused_scratch + fused_blocks + (2 << 20)

    use_fused = (not force_split) and (fused_est <= int(0.7 * capacity))

    if use_fused:
        out_padded = pl.pallas_call(
            functools.partial(_fused_head_kernel, tb=tb, inv_batch=inv_batch,
                              mxu_dtype=mxu_dtype),
            out_shape=jax.ShapeDtypeStruct((B, out_pad), x.dtype),
            grid=(3, nb),
            in_specs=[
                pl.BlockSpec((tb, in_pad), lambda p, i: (jnp.where(p == 0, i, 0), 0)),
                resident, resident, resident, resident, resident, resident,
            ],
            out_specs=pl.BlockSpec((tb, out_pad),
                                   lambda p, i: (jnp.where(p == 2, i, 0), 0)),
            scratch_shapes=[
                pltpu.VMEM((B, hid_pad), store_dtype),   # h resident
                pltpu.VMEM((B, out_pad), store_dtype),   # z resident
                pltpu.VMEM((1, hid_pad), jnp.float32),   # sum1 -> scale1
                pltpu.VMEM((1, hid_pad), jnp.float32),   # sumsq1 -> shift1
                pltpu.VMEM((1, out_pad), jnp.float32),   # sum2 -> scale2
                pltpu.VMEM((1, out_pad), jnp.float32),   # sumsq2 -> shift2
            ],
            compiler_params=pltpu.CompilerParams(
                dimension_semantics=("arbitrary", "arbitrary"),
                vmem_limit_bytes=_vmem_limit(fused_est, capacity)),
        )(xp, w1p, g1p, b1p, w2p, g2p, b2p)
        return out_padded[:, :out_f]

    # ---------- split path: h via HBM, then fused stage 2+3 ----------
    stage1_est = (in_pad * hid_pad * msz + 2 * tb * (in_pad * x_sz + hid_pad * store_sz)
                  + small_bytes + (2 << 20))
    h, s1, q1 = pl.pallas_call(
        functools.partial(_stage1_kernel, mxu_dtype=mxu_dtype),
        out_shape=(jax.ShapeDtypeStruct((B, hid_pad), store_dtype),
                   jax.ShapeDtypeStruct((1, hid_pad), jnp.float32),
                   jax.ShapeDtypeStruct((1, hid_pad), jnp.float32)),
        grid=(nb,),
        in_specs=[pl.BlockSpec((tb, in_pad), lambda i: (i, 0)), resident],
        out_specs=(pl.BlockSpec((tb, hid_pad), lambda i: (i, 0)),
                   pl.BlockSpec((1, hid_pad), lambda i: (0, 0)),
                   pl.BlockSpec((1, hid_pad), lambda i: (0, 0))),
        compiler_params=pltpu.CompilerParams(
            dimension_semantics=("arbitrary",),
            vmem_limit_bytes=_vmem_limit(stage1_est, capacity)),
    )(xp, w1p)

    stage23_est = (hid_pad * out_pad * msz + B * out_pad * store_sz
                   + 2 * tb * (hid_pad * store_sz + out_pad * o_sz)
                   + small_bytes + (2 << 20))
    out_padded = pl.pallas_call(
        functools.partial(_stage23_kernel, tb=tb, inv_batch=inv_batch,
                          mxu_dtype=mxu_dtype),
        out_shape=jax.ShapeDtypeStruct((B, out_pad), x.dtype),
        grid=(2, nb),
        in_specs=[
            pl.BlockSpec((tb, hid_pad), lambda p, i: (jnp.where(p == 0, i, 0), 0)),
            resident, resident, resident, resident, resident, resident, resident,
        ],
        out_specs=pl.BlockSpec((tb, out_pad),
                               lambda p, i: (jnp.where(p == 1, i, 0), 0)),
        scratch_shapes=[
            pltpu.VMEM((B, out_pad), store_dtype),   # z resident
            pltpu.VMEM((1, hid_pad), jnp.float32),   # scale1
            pltpu.VMEM((1, hid_pad), jnp.float32),   # shift1
            pltpu.VMEM((1, out_pad), jnp.float32),   # sum2 -> scale2
            pltpu.VMEM((1, out_pad), jnp.float32),   # sumsq2 -> shift2
        ],
        compiler_params=pltpu.CompilerParams(
            dimension_semantics=("arbitrary", "arbitrary"),
            vmem_limit_bytes=_vmem_limit(stage23_est, capacity)),
    )(h, s1, q1, g1p, b1p, w2p, g2p, b2p)
    return out_padded[:, :out_f]


# --------------------------------------------------------------------------
# Pure-JAX f32 reference with the module's exact semantics (for verification)
# --------------------------------------------------------------------------
def projection_head_reference(x, w1_t, gamma1, beta1, w2_t, gamma2, beta2):
    xf = x.astype(jnp.float32)
    xn = xf / jnp.sqrt(jnp.sum(xf * xf, axis=1, keepdims=True))
    h = xn @ w1_t.astype(jnp.float32)
    mu1 = h.mean(0, keepdims=True)
    var1 = ((h - mu1) ** 2).mean(0, keepdims=True)
    h = (h - mu1) / jnp.sqrt(var1 + BN_EPS) * gamma1.reshape(1, -1) + beta1.reshape(1, -1)
    h = jnp.maximum(h, 0.0)
    z = h @ w2_t.astype(jnp.float32)
    mu2 = z.mean(0, keepdims=True)
    var2 = ((z - mu2) ** 2).mean(0, keepdims=True)
    z = (z - mu2) / jnp.sqrt(var2 + BN_EPS) * gamma2.reshape(1, -1) + beta2.reshape(1, -1)
    return z.astype(x.dtype)


if __name__ == "__main__":
    # Small shapes consistent with the module: (batch, in_features) input.
    # Dims deliberately NOT multiples of 128 to exercise the padding path, and
    # max_batch_tile=16 so the batch axis is tiled (nb=3) to exercise the phase grid.
    B, IN_F, HID_F, OUT_F = 48, 56, 72, 24

    key = jax.random.PRNGKey(0)
    kx, kw1, kw2, kg1, kb1, kg2, kb2 = jax.random.split(key, 7)

    x = jax.random.normal(kx, (B, IN_F), dtype=jnp.float32)

    # nn.Linear-style uniform init (deterministic); stored pre-transposed (in, out).
    bound1 = 1.0 / (IN_F ** 0.5)
    w1_t = jax.random.uniform(kw1, (IN_F, HID_F), jnp.float32, -bound1, bound1)
    bound2 = 1.0 / (HID_F ** 0.5)
    w2_t = jax.random.uniform(kw2, (HID_F, OUT_F), jnp.float32, -bound2, bound2)

    # BatchNorm affine params (non-trivial, deterministic).
    gamma1 = 1.0 + 0.1 * jax.random.normal(kg1, (HID_F,), jnp.float32)
    beta1 = 0.1 * jax.random.normal(kb1, (HID_F,), jnp.float32)
    gamma2 = 1.0 + 0.1 * jax.random.normal(kg2, (OUT_F,), jnp.float32)
    beta2 = 0.1 * jax.random.normal(kb2, (OUT_F,), jnp.float32)

    ref = projection_head_reference(x, w1_t, gamma1, beta1, w2_t, gamma2, beta2)

    # f32 MXU path, fused single-kernel variant: must match the reference tightly.
    params_f32 = prepare_params(w1_t, gamma1, beta1, w2_t, gamma2, beta2,
                                mxu_dtype=jnp.float32)
    out_f32 = jax.block_until_ready(
        projection_head_forward(x, params_f32, max_batch_tile=16))
    assert out_f32.shape == (B, OUT_F)
    assert jnp.allclose(out_f32, ref, atol=5e-4, rtol=5e-4), "fused f32 path mismatch"

    # f32 MXU path, split (large-batch fallback) variant, forced for coverage.
    out_f32_split = jax.block_until_ready(
        projection_head_forward(x, params_f32, max_batch_tile=16, force_split=True))
    assert jnp.allclose(out_f32_split, ref, atol=5e-4, rtol=5e-4), "split f32 path mismatch"

    # Default fast path: bf16 MXU operands / bf16-resident intermediates.
    params_bf16 = prepare_params(w1_t, gamma1, beta1, w2_t, gamma2, beta2)
    out_bf16 = jax.block_until_ready(
        projection_head_forward(x, params_bf16, max_batch_tile=16))
    assert out_bf16.shape == (B, OUT_F)
    assert jnp.allclose(out_bf16, ref, atol=5e-2, rtol=5e-2), "fused bf16 path mismatch"

    print("KERNEL_OK")
</pallas_src>

<mosaic_0001>
module attributes {stable_mosaic.version = 11 : i64} {
  func.func @_fused_head_kernel(%arg0: i32, %arg1: i32, %arg2: memref<16x128xf32, #tpu.memory_space<vmem>>, %arg3: memref<128x128xf32, #tpu.memory_space<vmem>>, %arg4: memref<1x128xf32, #tpu.memory_space<vmem>>, %arg5: memref<1x128xf32, #tpu.memory_space<vmem>>, %arg6: memref<128x128xf32, #tpu.memory_space<vmem>>, %arg7: memref<1x128xf32, #tpu.memory_space<vmem>>, %arg8: memref<1x128xf32, #tpu.memory_space<vmem>>, %arg9: memref<16x128xf32, #tpu.memory_space<vmem>>, %arg10: memref<48x128xf32, #tpu.memory_space<vmem>>, %arg11: memref<48x128xf32, #tpu.memory_space<vmem>>, %arg12: memref<1x128xf32, #tpu.memory_space<vmem>>, %arg13: memref<1x128xf32, #tpu.memory_space<vmem>>, %arg14: memref<1x128xf32, #tpu.memory_space<vmem>>, %arg15: memref<1x128xf32, #tpu.memory_space<vmem>>) attributes {dimension_semantics = [#tpu.dimension_semantics<arbitrary>, #tpu.dimension_semantics<arbitrary>], iteration_bounds = array<i64: 3, 3>, scalar_prefetch = 0 : i64, scratch_operands = 6 : i64, tpu.core_type = #tpu.core_type<tc>, window_params = [{transform_indices = @transform_0, window_bounds = array<i64: 16, 128>}, {pipeline_mode = #tpu.pipeline_mode<synchronous>, transform_indices = @transform_1, window_bounds = array<i64: 128, 128>}, {pipeline_mode = #tpu.pipeline_mode<synchronous>, transform_indices = @transform_2, window_bounds = array<i64: 1, 128>}, {pipeline_mode = #tpu.pipeline_mode<synchronous>, transform_indices = @transform_3, window_bounds = array<i64: 1, 128>}, {pipeline_mode = #tpu.pipeline_mode<synchronous>, transform_indices = @transform_4, window_bounds = array<i64: 128, 128>}, {pipeline_mode = #tpu.pipeline_mode<synchronous>, transform_indices = @transform_5, window_bounds = array<i64: 1, 128>}, {pipeline_mode = #tpu.pipeline_mode<synchronous>, transform_indices = @transform_6, window_bounds = array<i64: 1, 128>}, {transform_indices = @transform_7, window_bounds = array<i64: 16, 128>}]} {
    %c16_i32 = arith.constant 16 : i32
    %0 = arith.muli %arg1, %c16_i32 : i32
    %1 = tpu.assume_multiple %0, 16 : i32
    %c0_i32 = arith.constant 0 : i32
    %2 = arith.cmpi eq, %arg0, %c0_i32 : i32
    %c0_i32_0 = arith.constant 0 : i32
    %3 = arith.cmpi eq, %arg1, %c0_i32_0 : i32
    %4 = arith.andi %2, %3 : i1
    %5 = arith.extui %4 : i1 to i32
    %c0_i32_1 = arith.constant 0 : i32
    %6 = arith.cmpi ne, %5, %c0_i32_1 : i32
    scf.if %6 {
      %cst = arith.constant 0.000000e+00 : f32
      %26 = vector.broadcast %cst : f32 to vector<1x128xf32>
      %c0 = arith.constant 0 : index
      %c0_12 = arith.constant 0 : index
      %27 = vector.load %arg12[%c0, %c0_12] : memref<1x128xf32, #tpu.memory_space<vmem>>, vector<1x128xf32>
      tpu.vector_store %arg12[%c0, %c0_12], %26 {strides = array<i32>} : memref<1x128xf32, #tpu.memory_space<vmem>>, vector<1x128xf32>,
      %cst_13 = arith.constant 0.000000e+00 : f32
      %28 = vector.broadcast %cst_13 : f32 to vector<1x128xf32>
      %c0_14 = arith.constant 0 : index
      %c0_15 = arith.constant 0 : index
      %29 = vector.load %arg13[%c0_14, %c0_15] : memref<1x128xf32, #tpu.memory_space<vmem>>, vector<1x128xf32>
      tpu.vector_store %arg13[%c0_14, %c0_15], %28 {strides = array<i32>} : memref<1x128xf32, #tpu.memory_space<vmem>>, vector<1x128xf32>,
      %cst_16 = arith.constant 0.000000e+00 : f32
      %30 = vector.broadcast %cst_16 : f32 to vector<1x128xf32>
      %c0_17 = arith.constant 0 : index
      %c0_18 = arith.constant 0 : index
      %31 = vector.load %arg14[%c0_17, %c0_18] : memref<1x128xf32, #tpu.memory_space<vmem>>, vector<1x128xf32>
      tpu.vector_store %arg14[%c0_17, %c0_18], %30 {strides = array<i32>} : memref<1x128xf32, #tpu.memory_space<vmem>>, vector<1x128xf32>,
      %cst_19 = arith.constant 0.000000e+00 : f32
      %32 = vector.broadcast %cst_19 : f32 to vector<1x128xf32>
      %c0_20 = arith.constant 0 : index
      %c0_21 = arith.constant 0 : index
      %33 = vector.load %arg15[%c0_20, %c0_21] : memref<1x128xf32, #tpu.memory_space<vmem>>, vector<1x128xf32>
      tpu.vector_store %arg15[%c0_20, %c0_21], %32 {strides = array<i32>} : memref<1x128xf32, #tpu.memory_space<vmem>>, vector<1x128xf32>,
    } else {
    }
    %c0_i32_2 = arith.constant 0 : i32
    %7 = arith.cmpi eq, %arg0, %c0_i32_2 : i32
    %8 = arith.extui %7 : i1 to i32
    %c0_i32_3 = arith.constant 0 : i32
    %9 = arith.cmpi ne, %8, %c0_i32_3 : i32
    scf.if %9 {
      %c0 = arith.constant 0 : index
      %c0_12 = arith.constant 0 : index
      %26 = vector.load %arg2[%c0, %c0_12] : memref<16x128xf32, #tpu.memory_space<vmem>>, vector<16x128xf32>
      %27 = arith.mulf %26, %26 : vector<16x128xf32>
      %cst = arith.constant dense<0.000000e+00> : vector<16xf32>
      %28 = vector.multi_reduction <add>, %27, %cst [1] : vector<16x128xf32> to vector<16xf32>
      %29 = vector.shape_cast %28 : vector<16xf32> to vector<16x1xf32>
      %30 = math.rsqrt %29 : vector<16x1xf32>
      %31 = vector.broadcast %30 : vector<16x1xf32> to vector<16x128xf32>
      %32 = arith.mulf %26, %31 : vector<16x128xf32>
      %c0_13 = arith.constant 0 : index
      %c0_14 = arith.constant 0 : index
      %33 = vector.load %arg3[%c0_13, %c0_14] : memref<128x128xf32, #tpu.memory_space<vmem>>, vector<128x128xf32>
      %cst_15 = arith.constant dense<0.000000e+00> : vector<16x128xf32>
      %34 = tpu.matmul %32, %33, %cst_15 {dimension_numbers = #tpu.dot_dimension_numbers<[1], [0], [0], [1], [0, 0, 1, 1], [], []>} : vector<16x128xf32>, vector<128x128xf32>, vector<16x128xf32> -> vector<16x128xf32>
      %35 = arith.index_cast %1 : i32 to index
      %c0_16 = arith.constant 0 : index
      %36 = vector.load %arg10[%35, %c0_16] : memref<48x128xf32, #tpu.memory_space<vmem>>, vector<16x128xf32>
      tpu.vector_store %arg10[%35, %c0_16], %34 {strides = array<i32>} : memref<48x128xf32, #tpu.memory_space<vmem>>, vector<16x128xf32>,
      %c0_17 = arith.constant 0 : index
      %c0_18 = arith.constant 0 : index
      %37 = vector.load %arg12[%c0_17, %c0_18] : memref<1x128xf32, #tpu.memory_space<vmem>>, vector<1x128xf32>
      %cst_19 = arith.constant dense<0.000000e+00> : vector<128xf32>
      %38 = vector.multi_reduction <add>, %34, %cst_19 [0] : vector<16x128xf32> to vector<128xf32>
      %39 = vector.shape_cast %38 : vector<128xf32> to vector<1x128xf32>
      %40 = arith.addf %37, %39 : vector<1x128xf32>
      %c0_20 = arith.constant 0 : index
      %c0_21 = arith.constant 0 : index
      %41 = vector.load %arg12[%c0_20, %c0_21] : memref<1x128xf32, #tpu.memory_space<vmem>>, vector<1x128xf32>
      tpu.vector_store %arg12[%c0_20, %c0_21], %40 {strides = array<i32>} : memref<1x128xf32, #tpu.memory_space<vmem>>, vector<1x128xf32>,
      %c0_22 = arith.constant 0 : index
      %c0_23 = arith.constant 0 : index
      %42 = vector.load %arg13[%c0_22, %c0_23] : memref<1x128xf32, #tpu.memory_space<vmem>>, vector<1x128xf32>
      %43 = arith.mulf %34, %34 : vector<16x128xf32>
      %cst_24 = arith.constant dense<0.000000e+00> : vector<128xf32>
      %44 = vector.multi_reduction <add>, %43, %cst_24 [0] : vector<16x128xf32> to vector<128xf32>
      %45 = vector.shape_cast %44 : vector<128xf32> to vector<1x128xf32>
      %46 = arith.addf %42, %45 : vector<1x128xf32>
      %c0_25 = arith.constant 0 : index
      %c0_26 = arith.constant 0 : index
      %47 = vector.load %arg13[%c0_25, %c0_26] : memref<1x128xf32, #tpu.memory_space<vmem>>, vector<1x128xf32>
      tpu.vector_store %arg13[%c0_25, %c0_26], %46 {strides = array<i32>} : memref<1x128xf32, #tpu.memory_space<vmem>>, vector<1x128xf32>,
    } else {
    }
    %c1_i32 = arith.constant 1 : i32
    %10 = arith.cmpi eq, %arg0, %c1_i32 : i32
    %c0_i32_4 = arith.constant 0 : i32
    %11 = arith.cmpi eq, %arg1, %c0_i32_4 : i32
    %12 = arith.andi %10, %11 : i1
    %13 = arith.extui %12 : i1 to i32
    %c0_i32_5 = arith.constant 0 : i32
    %14 = arith.cmpi ne, %13, %c0_i32_5 : i32
    scf.if %14 {
      %c0 = arith.constant 0 : index
      %c0_12 = arith.constant 0 : index
      %26 = vector.load %arg12[%c0, %c0_12] : memref<1x128xf32, #tpu.memory_space<vmem>>, vector<1x128xf32>
      %cst = arith.constant 0.020833334 : f32
      %27 = vector.broadcast %cst : f32 to vector<1x128xf32>
      %28 = arith.mulf %26, %27 : vector<1x128xf32>
      %c0_13 = arith.constant 0 : index
      %c0_14 = arith.constant 0 : index
      %29 = vector.load %arg13[%c0_13, %c0_14] : memref<1x128xf32, #tpu.memory_space<vmem>>, vector<1x128xf32>
      %cst_15 = arith.constant 0.020833334 : f32
      %30 = vector.broadcast %cst_15 : f32 to vector<1x128xf32>
      %31 = arith.mulf %29, %30 : vector<1x128xf32>
      %32 = arith.mulf %28, %28 : vector<1x128xf32>
      %33 = arith.subf %31, %32 : vector<1x128xf32>
      %cst_16 = arith.constant 0.000000e+00 : f32
      %34 = vector.broadcast %cst_16 : f32 to vector<1x128xf32>
      %35 = arith.maximumf %33, %34 : vector<1x128xf32>
      %c0_17 = arith.constant 0 : index
      %c0_18 = arith.constant 0 : index
      %36 = vector.load %arg4[%c0_17, %c0_18] : memref<1x128xf32, #tpu.memory_space<vmem>>, vector<1x128xf32>
      %cst_19 = arith.constant 9.99999974E-6 : f32
      %37 = vector.broadcast %cst_19 : f32 to vector<1x128xf32>
      %38 = arith.addf %35, %37 : vector<1x128xf32>
      %39 = math.rsqrt %38 : vector<1x128xf32>
      %40 = arith.mulf %36, %39 : vector<1x128xf32>
      %c0_20 = arith.constant 0 : index
      %c0_21 = arith.constant 0 : index
      %41 = vector.load %arg12[%c0_20, %c0_21] : memref<1x128xf32, #tpu.memory_space<vmem>>, vector<1x128xf32>
      tpu.vector_store %arg12[%c0_20, %c0_21], %40 {strides = array<i32>} : memref<1x128xf32, #tpu.memory_space<vmem>>, vector<1x128xf32>,
      %c0_22 = arith.constant 0 : index
      %c0_23 = arith.constant 0 : index
      %42 = vector.load %arg5[%c0_22, %c0_23] : memref<1x128xf32, #tpu.memory_space<vmem>>, vector<1x128xf32>
      %43 = arith.mulf %28, %40 : vector<1x128xf32>
      %44 = arith.subf %42, %43 : vector<1x128xf32>
      %c0_24 = arith.constant 0 : index
      %c0_25 = arith.constant 0 : index
      %45 = vector.load %arg13[%c0_24, %c0_25] : memref<1x128xf32, #tpu.memory_space<vmem>>, vector<1x128xf32>
      tpu.vector_store %arg13[%c0_24, %c0_25], %44 {strides = array<i32>} : memref<1x128xf32, #tpu.memory_space<vmem>>, vector<1x128xf32>,
    } else {
    }
    %c1_i32_6 = arith.constant 1 : i32
    %15 = arith.cmpi eq, %arg0, %c1_i32_6 : i32
    %16 = arith.extui %15 : i1 to i32
    %c0_i32_7 = arith.constant 0 : i32
    %17 = arith.cmpi ne, %16, %c0_i32_7 : i32
    scf.if %17 {
      %26 = arith.index_cast %1 : i32 to index
      %c0 = arith.constant 0 : index
      %27 = vector.load %arg10[%26, %c0] : memref<48x128xf32, #tpu.memory_space<vmem>>, vector<16x128xf32>
      %c0_12 = arith.constant 0 : index
      %c0_13 = arith.constant 0 : index
      %28 = vector.load %arg12[%c0_12, %c0_13] : memref<1x128xf32, #tpu.memory_space<vmem>>, vector<1x128xf32>
      %29 = vector.broadcast %28 : vector<1x128xf32> to vector<16x128xf32>
      %30 = arith.mulf %27, %29 : vector<16x128xf32>
      %c0_14 = arith.constant 0 : index
      %c0_15 = arith.constant 0 : index
      %31 = vector.load %arg13[%c0_14, %c0_15] : memref<1x128xf32, #tpu.memory_space<vmem>>, vector<1x128xf32>
      %32 = vector.broadcast %31 : vector<1x128xf32> to vector<16x128xf32>
      %33 = arith.addf %30, %32 : vector<16x128xf32>
      %cst = arith.constant 0.000000e+00 : f32
      %34 = vector.broadcast %cst : f32 to vector<16x128xf32>
      %35 = arith.maximumf %33, %34 : vector<16x128xf32>
      %c0_16 = arith.constant 0 : index
      %c0_17 = arith.constant 0 : index
      %36 = vector.load %arg6[%c0_16, %c0_17] : memref<128x128xf32, #tpu.memory_space<vmem>>, vector<128x128xf32>
      %cst_18 = arith.constant dense<0.000000e+00> : vector<16x128xf32>
      %37 = tpu.matmul %35, %36, %cst_18 {dimension_numbers = #tpu.dot_dimension_numbers<[1], [0], [0], [1], [0, 0, 1, 1], [], []>} : vector<16x128xf32>, vector<128x128xf32>, vector<16x128xf32> -> vector<16x128xf32>
      %38 = arith.index_cast %1 : i32 to index
      %c0_19 = arith.constant 0 : index
      %39 = vector.load %arg11[%38, %c0_19] : memref<48x128xf32, #tpu.memory_space<vmem>>, vector<16x128xf32>
      tpu.vector_store %arg11[%38, %c0_19], %37 {strides = array<i32>} : memref<48x128xf32, #tpu.memory_space<vmem>>, vector<16x128xf32>,
      %c0_20 = arith.constant 0 : index
      %c0_21 = arith.constant 0 : index
      %40 = vector.load %arg14[%c0_20, %c0_21] : memref<1x128xf32, #tpu.memory_space<vmem>>, vector<1x128xf32>
      %cst_22 = arith.constant dense<0.000000e+00> : vector<128xf32>
      %41 = vector.multi_reduction <add>, %37, %cst_22 [0] : vector<16x128xf32> to vector<128xf32>
      %42 = vector.shape_cast %41 : vector<128xf32> to vector<1x128xf32>
      %43 = arith.addf %40, %42 : vector<1x128xf32>
      %c0_23 = arith.constant 0 : index
      %c0_24 = arith.constant 0 : index
      %44 = vector.load %arg14[%c0_23, %c0_24] : memref<1x128xf32, #tpu.memory_space<vmem>>, vector<1x128xf32>
      tpu.vector_store %arg14[%c0_23, %c0_24], %43 {strides = array<i32>} : memref<1x128xf32, #tpu.memory_space<vmem>>, vector<1x128xf32>,
      %c0_25 = arith.constant 0 : index
      %c0_26 = arith.constant 0 : index
      %45 = vector.load %arg15[%c0_25, %c0_26] : memref<1x128xf32, #tpu.memory_space<vmem>>, vector<1x128xf32>
      %46 = arith.mulf %37, %37 : vector<16x128xf32>
      %cst_27 = arith.constant dense<0.000000e+00> : vector<128xf32>
      %47 = vector.multi_reduction <add>, %46, %cst_27 [0] : vector<16x128xf32> to vector<128xf32>
      %48 = vector.shape_cast %47 : vector<128xf32> to vector<1x128xf32>
      %49 = arith.addf %45, %48 : vector<1x128xf32>
      %c0_28 = arith.constant 0 : index
      %c0_29 = arith.constant 0 : index
      %50 = vector.load %arg15[%c0_28, %c0_29] : memref<1x128xf32, #tpu.memory_space<vmem>>, vector<1x128xf32>
      tpu.vector_store %arg15[%c0_28, %c0_29], %49 {strides = array<i32>} : memref<1x128xf32, #tpu.memory_space<vmem>>, vector<1x128xf32>,
    } else {
    }
    %c2_i32 = arith.constant 2 : i32
    %18 = arith.cmpi eq, %arg0, %c2_i32 : i32
    %c0_i32_8 = arith.constant 0 : i32
    %19 = arith.cmpi eq, %arg1, %c0_i32_8 : i32
    %20 = arith.andi %18, %19 : i1
    %21 = arith.extui %20 : i1 to i32
    %c0_i32_9 = arith.constant 0 : i32
    %22 = arith.cmpi ne, %21, %c0_i32_9 : i32
    scf.if %22 {
      %c0 = arith.constant 0 : index
      %c0_12 = arith.constant 0 : index
      %26 = vector.load %arg14[%c0, %c0_12] : memref<1x128xf32, #tpu.memory_space<vmem>>, vector<1x128xf32>
      %cst = arith.constant 0.020833334 : f32
      %27 = vector.broadcast %cst : f32 to vector<1x128xf32>
      %28 = arith.mulf %26, %27 : vector<1x128xf32>
      %c0_13 = arith.constant 0 : index
      %c0_14 = arith.constant 0 : index
      %29 = vector.load %arg15[%c0_13, %c0_14] : memref<1x128xf32, #tpu.memory_space<vmem>>, vector<1x128xf32>
      %cst_15 = arith.constant 0.020833334 : f32
      %30 = vector.broadcast %cst_15 : f32 to vector<1x128xf32>
      %31 = arith.mulf %29, %30 : vector<1x128xf32>
      %32 = arith.mulf %28, %28 : vector<1x128xf32>
      %33 = arith.subf %31, %32 : vector<1x128xf32>
      %cst_16 = arith.constant 0.000000e+00 : f32
      %34 = vector.broadcast %cst_16 : f32 to vector<1x128xf32>
      %35 = arith.maximumf %33, %34 : vector<1x128xf32>
      %c0_17 = arith.constant 0 : index
      %c0_18 = arith.constant 0 : index
      %36 = vector.load %arg7[%c0_17, %c0_18] : memref<1x128xf32, #tpu.memory_space<vmem>>, vector<1x128xf32>
      %cst_19 = arith.constant 9.99999974E-6 : f32
      %37 = vector.broadcast %cst_19 : f32 to vector<1x128xf32>
      %38 = arith.addf %35, %37 : vector<1x128xf32>
      %39 = math.rsqrt %38 : vector<1x128xf32>
      %40 = arith.mulf %36, %39 : vector<1x128xf32>
      %c0_20 = arith.constant 0 : index
      %c0_21 = arith.constant 0 : index
      %41 = vector.load %arg14[%c0_20, %c0_21] : memref<1x128xf32, #tpu.memory_space<vmem>>, vector<1x128xf32>
      tpu.vector_store %arg14[%c0_20, %c0_21], %40 {strides = array<i32>} : memref<1x128xf32, #tpu.memory_space<vmem>>, vector<1x128xf32>,
      %c0_22 = arith.constant 0 : index
      %c0_23 = arith.constant 0 : index
      %42 = vector.load %arg8[%c0_22, %c0_23] : memref<1x128xf32, #tpu.memory_space<vmem>>, vector<1x128xf32>
      %43 = arith.mulf %28, %40 : vector<1x128xf32>
      %44 = arith.subf %42, %43 : vector<1x128xf32>
      %c0_24 = arith.constant 0 : index
      %c0_25 = arith.constant 0 : index
      %45 = vector.load %arg15[%c0_24, %c0_25] : memref<1x128xf32, #tpu.memory_space<vmem>>, vector<1x128xf32>
      tpu.vector_store %arg15[%c0_24, %c0_25], %44 {strides = array<i32>} : memref<1x128xf32, #tpu.memory_space<vmem>>, vector<1x128xf32>,
    } else {
    }
    %c2_i32_10 = arith.constant 2 : i32
    %23 = arith.cmpi eq, %arg0, %c2_i32_10 : i32
    %24 = arith.extui %23 : i1 to i32
    %c0_i32_11 = arith.constant 0 : i32
    %25 = arith.cmpi ne, %24, %c0_i32_11 : i32
    scf.if %25 {
      %26 = arith.index_cast %1 : i32 to index
      %c0 = arith.constant 0 : index
      %27 = vector.load %arg11[%26, %c0] : memref<48x128xf32, #tpu.memory_space<vmem>>, vector<16x128xf32>
      %c0_12 = arith.constant 0 : index
      %c0_13 = arith.constant 0 : index
      %28 = vector.load %arg14[%c0_12, %c0_13] : memref<1x128xf32, #tpu.memory_space<vmem>>, vector<1x128xf32>
      %29 = vector.broadcast %28 : vector<1x128xf32> to vector<16x128xf32>
      %30 = arith.mulf %27, %29 : vector<16x128xf32>
      %c0_14 = arith.constant 0 : index
      %c0_15 = arith.constant 0 : index
      %31 = vector.load %arg15[%c0_14, %c0_15] : memref<1x128xf32, #tpu.memory_space<vmem>>, vector<1x128xf32>
      %32 = vector.broadcast %31 : vector<1x128xf32> to vector<16x128xf32>
      %33 = arith.addf %30, %32 : vector<16x128xf32>
      %c0_16 = arith.constant 0 : index
      %c0_17 = arith.constant 0 : index
      %34 = vector.load %arg9[%c0_16, %c0_17] : memref<16x128xf32, #tpu.memory_space<vmem>>, vector<16x128xf32>
      tpu.vector_store %arg9[%c0_16, %c0_17], %33 {strides = array<i32>} : memref<16x128xf32, #tpu.memory_space<vmem>>, vector<16x128xf32>,
    } else {
    }
    return
  }
  func.func @transform_0(%arg0: i32, %arg1: i32) -> (i32, i32) {
    %c0_i32 = arith.constant 0 : i32
    %0 = arith.cmpi eq, %arg0, %c0_i32 : i32
    %c0_i32_0 = arith.constant 0 : i32
    %1 = arith.select %0, %arg1, %c0_i32_0 : i32
    %c0_i32_1 = arith.constant 0 : i32
    %c0_i32_2 = arith.constant 0 : i32
    return %1, %c0_i32_1 : i32, i32
  }
  func.func @transform_1(%arg0: i32, %arg1: i32) -> (i32, i32) {
    %c0_i32 = arith.constant 0 : i32
    %c0_i32_0 = arith.constant 0 : i32
    %c0_i32_1 = arith.constant 0 : i32
    return %c0_i32, %c0_i32_0 : i32, i32
  }
  func.func @transform_2(%arg0: i32, %arg1: i32) -> (i32, i32) {
    %c0_i32 = arith.constant 0 : i32
    %c0_i32_0 = arith.constant 0 : i32
    %c0_i32_1 = arith.constant 0 : i32
    return %c0_i32, %c0_i32_0 : i32, i32
  }
  func.func @transform_3(%arg0: i32, %arg1: i32) -> (i32, i32) {
    %c0_i32 = arith.constant 0 : i32
    %c0_i32_0 = arith.constant 0 : i32
    %c0_i32_1 = arith.constant 0 : i32
    return %c0_i32, %c0_i32_0 : i32, i32
  }
  func.func @transform_4(%arg0: i32, %arg1: i32) -> (i32, i32) {
    %c0_i32 = arith.constant 0 : i32
    %c0_i32_0 = arith.constant 0 : i32
    %c0_i32_1 = arith.constant 0 : i32
    return %c0_i32, %c0_i32_0 : i32, i32
  }
  func.func @transform_5(%arg0: i32, %arg1: i32) -> (i32, i32) {
    %c0_i32 = arith.constant 0 : i32
    %c0_i32_0 = arith.constant 0 : i32
    %c0_i32_1 = arith.constant 0 : i32
    return %c0_i32, %c0_i32_0 : i32, i32
  }
  func.func @transform_6(%arg0: i32, %arg1: i32) -> (i32, i32) {
    %c0_i32 = arith.constant 0 : i32
    %c0_i32_0 = arith.constant 0 : i32
    %c0_i32_1 = arith.constant 0 : i32
    return %c0_i32, %c0_i32_0 : i32, i32
  }
  func.func @transform_7(%arg0: i32, %arg1: i32) -> (i32, i32) {
    %c2_i32 = arith.constant 2 : i32
    %0 = arith.cmpi eq, %arg0, %c2_i32 : i32
    %c0_i32 = arith.constant 0 : i32
    %1 = arith.select %0, %arg1, %c0_i32 : i32
    %c0_i32_0 = arith.constant 0 : i32
    %c0_i32_1 = arith.constant 0 : i32
    return %1, %c0_i32_0 : i32, i32
  }
}

</mosaic_0001>

<bundles_post_ra>
// kernel: tpu_custom_call.1
= control target key start
LH: loop header
LB: loop body
LE: loop exit
PB: predicated region body
PF: predicated region fallthrough
CT: control target
= control target key end

     0   :  { %s1784_s0 = inlined_call_operand.hbm [shape: f32[48,128], index: 0, kind: input, shape index: {}]   ;;  %s1785_s1 = inlined_call_operand.hbm [shape: f32[128,128], index: 1, kind: input, shape index: {}]   ;;  %s1786_s2 = inlined_call_operand.vmem [shape: f32[1,128], index: 2, kind: input, shape index: {}]   ;;  %s1787_s3 = inlined_call_operand.vmem [shape: f32[1,128], index: 3, kind: input, shape index: {}]   ;;  %s1788_s4 = inlined_call_operand.hbm [shape: f32[128,128], index: 4, kind: input, shape index: {}]   ;;  %s1789_s5 = inlined_call_operand.vmem [shape: f32[1,128], index: 5, kind: input, shape index: {}]   ;;  %s1790_s6 = inlined_call_operand.vmem [shape: f32[1,128], index: 6, kind: input, shape index: {}]   ;;  %s1791_s7 = inlined_call_operand.hbm [shape: f32[48,128], index: 7, kind: output, shape index: {}]  }
   0x1   :  { %1806 = sst [smem:[#allocation23_spill]] %s1785_s1 }
   0x2   :  { %1807 = sst [smem:[#allocation24_spill]] %s1787_s3 }
   0x3   :  { %1808 = sst [smem:[#allocation25_spill]] %s1788_s4 }
   0x4   :  { %1809 = sst [smem:[#allocation26_spill]] %s1789_s5 }
   0x5   :  { %1810 = sst [smem:[#allocation27_spill]] %s1790_s6 }
   0x6   :  { %1811 = sst [smem:[#allocation28_spill]] %s1791_s7 }
   0x7   :  { %12 = vsyncpa [#allocation9], 0 }
   0x8   :  { %14 = vsyncpa [#allocation9 + $0x1], 0 }
   0x9   :  { %15 = vsyncpa [#allocation12], 0 }
   0xa   :  { %16 = vsyncpa [#allocation10], 0 }
   0xb   :  { %18 = vsyncpa [#allocation10 + $0x1], 0  ;;  %s1431_s24 = smov 0   ;;  %s1433_s25 = smov 0  }
   0xc   :  { %s1435_s26 = smov 0   ;;  %s1437_s27 = smov 0  }
   0xd   :  { %s1439_s28 = smov 0   ;;  %s1441_s29 = smov 0  }
   0xe   :  { %s1443_s30 = smov 0   ;;  %s1445_s8 = smov 0  }
   0xf   :  { %s1447_s9 = smov 0   ;;  %s1449_s10 = smov 0  }
  0x10   :  { %s1451_s11 = smov 0  }
  0x11 LB: > { %1812 = sst [smem:[#allocation18_spill]] %s1340_s24  ;;  %s833_s12 = sadd.s32 4294967295, %s1380_s11   ;;  %s1380_s11 = sphi %s1451_s11, %s24_s11   ;;  %s1376_s10 = sphi %s1449_s10, %s1843_s10   ;;  %s1372_s9 = sphi %s1447_s9, %s1851_s9   ;;  %s1368_s8 = sphi %s1445_s8, %s1842_s8   ;;  %s1364_s30 = sphi %s1443_s30, %s1850_s30   ;;  %s1360_s29 = sphi %s1441_s29, %s1849_s29   ;;  %s1356_s28 = sphi %s1439_s28, %s1848_s28   ;;  %s1352_s27 = sphi %s1437_s27, %s1847_s27   ;;  %s1348_s26 = sphi %s1435_s26, %s1846_s26   ;;  %s1344_s25 = sphi %s1433_s25, %s1845_s25   ;;  %s1340_s24 = sphi %s1431_s24, %s1844_s24  }
  0x12   : > { %1813 = sst [smem:[#allocation19_spill]] %s1376_s10  ;;  %s834_s13 = sadd.s32 4294967294, %s1380_s11  }
  0x13   : > { %p60_p0 = scmp.ne.s32.totalorder %s1356_s28, %s1352_s27  ;;  %p1487_p1 = scmp.eq.s32.totalorder %s833_s12, 0 }
  0x14   : > { %p213_p2 = scmp.ne.s32.totalorder %s1348_s26, %s1344_s25  ;;  %p214_p4 = scmp.eq.s32.totalorder %s833_s12, 8 }
  0x15   : > { %s1814_s14 = scalar_select %p1487_p1, 1, 0 }
  0x16   : > { %p1496_p3 = por %p1487_p1, %p60_p0  ;;  %p219_p5 = scmp.ne.s32.totalorder %s1344_s25, %s1340_s24 }
  0x17   : > { %p220_p6 = scmp.eq.s32.totalorder %s834_s13, 8  ;;  %p1502_p7 = por %p214_p4, %p213_p2 }
  0x18   : > { %s1815_s16 = scalar_select %p1496_p3, 1, 0 }
  0x19   : > { %s1816_s17 = scalar_select %p1502_p7, 1, 0 }
  0x1a   : > { %p835_p8 = scmp.ge.s32.totalorder %s1380_s11, 1  ;;  %p1507_p9 = por %p220_p6, %p219_p5 }
  0x1b   : > { %1817 = sst [smem:[#allocation20_spill]] %s1816_s17  ;;  %p227_p10 = scmp.lt.s32.totalorder %s1380_s11, 10 }
  0x1c   : > { %s1818_s18 = scalar_select %p1507_p9, 1, 0 }
  0x1d   : > { %p1512_p11 = pnand %p835_p8, %p227_p10  ;;  %s1382_s20 = smov [#allocation11]  }
  0x1e   : > { %1819 = sst [smem:[#allocation21_spill]] %s1818_s18  ;;  %s239_s21 = sshll.u32 %s1382_s20, 4  ;;  %s240_s21 = int_to_ptr.vmem [resolvable:$true] %s239_s21 }
  0x1f   : > { %s1820_s19 = scalar_select %p1512_p11, 1, 0 }
  0x20   : > { %p1044_p12 = pneg %p1512_p11  ;;  %s1383_s23 = smov [#allocation13]  }
  0x21   : > { %s258_s27 = sshll.u32 %s1383_s23, 4  ;;  %s1822_s1 = sld [smem:[#allocation23_spill]]  ;;  %s1524_s27 = int_to_ptr.vmem [resolvable:$true] %s258_s27 }
  0x22   : > { %p1520_p13 = pnand %p1044_p12, %p1487_p1 }
  0x24   : > { %p1170_p2 = pneg %p1520_p13 }
  0x27   : > { %s1168_s15 = scalar_lea.hbm %s1822_s1, 2048 }
  0x28   : > { %p1169_p0 = scmp.ne.s32.totalorder %s1822_s1, %s1168_s15  ;;  %p1175_p6 = scmp.lt.u32.totalorder %s1168_s15, %s1822_s1 }
  0x2a   : > { %p1171_p4 = pnand %p1170_p2, %p1169_p0 }
  0x2c   : > { %p1172_p5 = pneg %p1171_p4 }
  0x2e   : > { %p1177_p8 = pnand %p1175_p6, %p1172_p5 }
  0x30   : > { %1180 = shalt.err (!%p1177_p8)
}
  0x31   : > { %s1181_s23 = scalar_lea.vmem %s240_s21, 2048  ;;  %p1189_p7 = scmp.lt.s32.totalorder %s240_s21, %s240_s21 }
  0x32   : > { %p1182_p10 = scmp.ne.s32.totalorder %s240_s21, %s1181_s23  ;;  %p1190_p1 = scmp.lt.s32.totalorder %s1181_s23, %s1181_s23 }
  0x34   : > { %p1184_p12 = pnand %p1182_p10, %p1170_p2  ;;  %p1191_p3 = por %p1190_p1, %p1189_p7 }
  0x36   : > { %p1185_p9 = pneg %p1184_p12 }
  0x38   : > { %p1192_p11 = pnand %p1191_p3, %p1185_p9 }
  0x3a   : > { %1195 = shalt.err (!%p1192_p11)
}
  0x3b   : > { %s1802_s18 = smov 128   ;;  %s1803_s12 = smov 8  }
  0x3c   : > { %1047 = dma.hbm_to_vmem [thread:$0]  (!%p1520_p13), %s1822_s1, 2048, %s240_s21, [#allocation12], %s1802_s18, %s1802_s18, %s1803_s12  }
  0x3d   : > { %s1823_s4 = sld [smem:[#allocation25_spill]] }
  0x43   : > { %s1196_s20 = scalar_lea.hbm %s1823_s4, 2048 }
  0x44   : > { %p1197_p1 = scmp.ne.s32.totalorder %s1823_s4, %s1196_s20  ;;  %p1203_p9 = scmp.lt.u32.totalorder %s1196_s20, %s1823_s4 }
  0x46   : > { %p1199_p3 = pnand %p1197_p1, %p1170_p2 }
  0x48   : > { %p1200_p7 = pneg %p1199_p3 }
  0x4a   : > { %p1205_p11 = pnand %p1203_p9, %p1200_p7 }
  0x4c   : > { %1208 = shalt.err (!%p1205_p11)
}
  0x4d   : > { %s1209_s21 = scalar_lea.vmem %s1524_s27, 2048  ;;  %p1217_p6 = scmp.lt.s32.totalorder %s1524_s27, %s1524_s27 }
  0x4e   : > { %p1210_p0 = scmp.ne.s32.totalorder %s1524_s27, %s1209_s21  ;;  %p1218_p8 = scmp.lt.s32.totalorder %s1209_s21, %s1209_s21 }
  0x50   : > { %p1212_p4 = pnand %p1210_p0, %p1170_p2  ;;  %p1219_p10 = por %p1218_p8, %p1217_p6 }
  0x52   : > { %p1213_p5 = pneg %p1212_p4 }
  0x54   : > { %p1220_p12 = pnand %p1219_p10, %p1213_p5 }
  0x56   : > { %1223 = shalt.err (!%p1220_p12)
}
  0x57   : > { %1050 = dma.hbm_to_vmem [thread:$0]  (!%p1520_p13), %s1823_s4, 2048, %s1524_s27, [#allocation12], %s1802_s18, %s1802_s18, %s1803_s12  }
  0x58   : > { %s33_s17 = sadd.s32 1, %s1372_s9  ;;  %s36_s22 = sadd.s32 1, %s1376_s10 }
  0x59   : > { %p34_p2 = scmp.ge.s32.totalorder %s33_s17, 3  ;;  %p40_p1 = scmp.eq.s32.totalorder %s1376_s10, 0 }
  0x5a   : > { %s47_s7 = sadd.s32 1, %s1360_s29  ;;  %p54_p3 = scmp.ne.s32.totalorder %s1360_s29, %s1356_s28 }
  0x5b   : > { %s1853_s17 = smov (%p34_p2, %s33_s17), 0  ;;  %s1855_s22 = smov (!%p34_p2, %s36_s22), %s1376_s10 }
  0x5c   : > { %s41_s24 = scalar_select %p40_p1, %s1372_s9, 0 }
  0x5d   : > { %p38_p7 = scmp.ge.s32.totalorder %s1855_s22, 3  ;;  %p55_p9 = scmp.eq.s32.totalorder %s1380_s11, 0 }
  0x5e   : > { %p196_p11 = scmp.eq.s32.totalorder %s1376_s10, 2  ;;  %p1061_p13 = scmp.lt.s32.totalorder %s1380_s11, 9 }
  0x5f   : > { %s1857_s22 = smov (%p38_p7, %s1855_s22), 0  ;;  %p1594_p0 = por %p55_p9, %p54_p3 }
  0x60   : > { %1824 = sst [smem:[#allocation22_spill]] %s1857_s22  ;;  %s278_s15 = sand.u32 1, %s1360_s29  }
  0x61   : > { %p42_p4 = scmp.eq.s32.totalorder %s1857_s22, 0  ;;  %p198_p5 = scmp.eq.s32.totalorder %s1857_s22, 2 }
  0x62   : > { %s197_s13 = scalar_select %p196_p11, %s1372_s9, 0 }
  0x63   : > { %s43_s20 = scalar_select %p42_p4, %s1853_s17, 0 }
  0x64   : > { %s199_s23 = scalar_select %p198_p5, %s1853_s17, 0 }
  0x65   : > { %s44_s21 = ssub.s32 %s41_s24, %s43_s20  ;;  %s839_s6 = sshll.u32 %s278_s15, 4 }
  0x66   : > { %p45_p6 = scmp.eq.s32.totalorder %s44_s21, 0  ;;  %s200_s5 = ssub.s32 %s197_s13, %s199_s23 }
  0x67   : > { %p201_p8 = scmp.eq.s32.totalorder %s200_s5, 0  ;;  %s1826_s12 = sadd.s32 1, %s1348_s26 }
  0x68   : > { %s1605_s18 = scalar_select %p45_p6, %s1360_s29, %s47_s7  }
  0x69   : > { %s1610_s1 = scalar_select %p201_p8, %s1348_s26, %s1826_s12  }
  0x6a   : > { %s860_s4 = sshll.u32 %s41_s24, 8  ;;  %s282_s20 = scalar_lea.vmem [#allocation8], %s839_s6 }
  0x6b   : > { %s1615_s22 = scalar_lea.hbm %s1784_s0, %s860_s4  ;;  %s291_s21 = sshll.u32 %s282_s20, 4  ;;  %s1617_s21 = int_to_ptr.vmem [resolvable:$true] %s291_s21 }
  0x6c   : > { %p1623_p10 = pnand %p1061_p13, %p1594_p0  ;;  %s1627_s12 = scalar_lea.sflag [#allocation9], %s278_s15 }
  0x6d   : > { %s1224_s3 = scalar_lea.hbm %s1615_s22, 256  ;;  %s1229_s24 = scalar_lea.hbm %s1784_s0, 768 }
  0x6e   : > { %p1225_p12 = scmp.ne.s32.totalorder %s1615_s22, %s1224_s3  ;;  %p1226_p2 = pneg %p1623_p10 }
  0x6f   : > { %p1230_p7 = scmp.lt.u32.totalorder %s1615_s22, %s1784_s0  ;;  %p1231_p9 = scmp.lt.u32.totalorder %s1229_s24, %s1224_s3 }
  0x70   : > { %p1227_p1 = pnand %p1226_p2, %p1225_p12  ;;  %p1233_p13 = scmp.lt.u32.totalorder %s1224_s3, %s1615_s22 }
  0x71   : > { %p1232_p11 = por %p1231_p9, %p1230_p7 }
  0x72   : > { %p1228_p3 = pneg %p1227_p1 }
  0x73   : > { %p1234_p0 = por %p1233_p13, %p1232_p11 }
  0x75   : > { %p1235_p4 = pnand %p1234_p0, %p1228_p3 }
  0x77   : > { %1238 = shalt.err (!%p1235_p4)
}
  0x78   : > { %s1239_s15 = scalar_lea.vmem %s1617_s21, 256  ;;  %s1386_s23 = smov [#allocation8]  }
  0x79   : > { %p1240_p5 = scmp.ne.s32.totalorder %s1617_s21, %s1239_s15  ;;  %s1244_s5 = sshll.u32 %s1386_s23, 4  ;;  %s1245_s5 = int_to_ptr.vmem [resolvable:$false] %s1244_s5 }
  0x7a   : > { %s1246_s6 = scalar_lea.vmem %s1245_s5, 512  ;;  %p1247_p12 = scmp.lt.s32.totalorder %s1617_s21, %s1245_s5 }
  0x7b   : > { %p1242_p6 = pnand %p1240_p5, %p1226_p2  ;;  %p1248_p1 = scmp.lt.s32.totalorder %s1246_s6, %s1239_s15 }
  0x7d   : > { %p1243_p8 = pneg %p1242_p6  ;;  %p1249_p7 = por %p1248_p1, %p1247_p12 }
  0x7f   : > { %p1250_p9 = pnand %p1249_p7, %p1243_p8 }
  0x81   : > { %1253 = shalt.err (!%p1250_p9)
}
  0x82   : > { %s1828_s20 = smov 8   ;;  %s1829_s3 = smov 128  }
  0x83   : > { %1054 = dma.hbm_to_vmem [thread:$0]  (!%p1623_p10), %s1615_s22, 256, %s1617_s21, %s1627_s12, %s1829_s3, %s1829_s3, %s1828_s20  }
  0x84   : > { %p1830_p2 = scmp.ne.s32.totalorder %s1820_s19, 0 }
  0x85   : > { %s305_s4 = sand.u32 (!%p1830_p2), 1, %s1356_s28   ;;  %p1831_p3 = scmp.ne.s32.totalorder (!%p1830_p2), %s1815_s16, 0 }
  0x86   : > { %303 = sbr.rel (%p1830_p2) target bundleno = 925 (0x39d), region = 48  ;;  %s843_s10 = sshll.u32 (!%p1830_p2), %s305_s4, 4 }
  0x87   : > { %s306_s24 = scalar_lea.sflag (!%p1830_p2), [#allocation9], %s305_s4  ;;  %s309_s27 = scalar_lea.vmem (!%p1830_p2), [#allocation8], %s843_s10 }
  0x8d   : > { %1327 = dma.done.wait (%p1831_p3), %s306_s24, 256  }
  0x8e   : > { %1329 = vsyncadd (%p1831_p3), %s306_s24, 4294967040  ;;  %p1832_p11 = scmp.ne.s32.totalorder %s1814_s14, 0 }
  0x90   : > { %1331 = dma.done.wait (%p1832_p11), [#allocation12], 4096  }
  0x91   : > { %1333 = vsyncadd (%p1832_p11), [#allocation12], 4294963200  ;;  %s345_s19 = sand.u32 1, %s1344_s25   ;;  %s1671_s22 = sshll.u32 %s1364_s30, 4 }
  0x92   : > { %s846_s21 = sshll.u32 %s345_s19, 4  ;;  %p355_p10 = scmp.eq.s32.totalorder %s1368_s8, 0 }
  0x93   : > { %p356_p13 = scmp.eq.s32.totalorder %s1364_s30, 0  ;;  %s1679_s16 = scalar_lea.vmem [#allocation14], %s846_s21 }
  0x95   : > { %p357_p0 = pnand %p356_p13, %p355_p10 }
  0x96   : > { %v1387_v0 = vmov (!%p357_p0), 0.0  }
  0x97   : > { %360 = sbr.rel (%p357_p0) target bundleno = 158 (0x9e), region = 64  ;;  %361 = vst [vmem:[#allocation4] sm:$0x1] (!%p357_p0), %v1387_v0  ;;  %362 = vst [vmem:[#allocation5] sm:$0x1] (!%p357_p0), %v1387_v0 }
  0x98   : > { %363 = vst [vmem:[#allocation6] sm:$0x1] (!%p357_p0), %v1387_v0  ;;  %364 = vst [vmem:[#allocation7] sm:$0x1] (!%p357_p0), %v1387_v0 }
  0x9e PF: > { %p848_p4 = scmp.ne.s32.totalorder %s1368_s8, 0 }
  0x9f   : > { %v368_v1 = vld [vmem:[%s309_s27] sm:$0xff] (!%p848_p4)  ;;  %v369_v2 = vld [vmem:[%s309_s27 + $0x8] sm:$0xff] (!%p848_p4)  ;;  %s471_s14 = scalar_lea.vmem (!%p848_p4), [#allocation2], %s1671_s22 }
  0xa0   : > { %367 = sbr.rel (%p848_p4) target bundleno = 553 (0x229), region = 68  ;;  %v380_v3 = vld [vmem:[#allocation11] sm:$0xff] (!%p848_p4)  ;;  %v370_v4 = vmul.f32 (!%p848_p4), %v368_v1, %v368_v1  ;;  %v381_v5 = vld [vmem:[#allocation11 + $0x8] sm:$0xff] (!%p848_p4)  ;;  %v382_v6 = vld [vmem:[#allocation11 + $0x10] sm:$0xff] (!%p848_p4)  ;;  %v371_v10 = vmul.f32 (!%p848_p4), %v369_v2, %v369_v2 }
  0xa1   : > { %v383_v7 = vld [vmem:[#allocation11 + $0x18] sm:$0xff] (!%p848_p4)  ;;  %v968_v8 = vpack.c.bf16 (!%p848_p4), %v381_v5, %v380_v3  ;;  %v384_v11 = vld [vmem:[#allocation11 + $0x20] sm:$0xff] (!%p848_p4)  ;;  %v385_v12 = vld [vmem:[#allocation11 + $0x28] sm:$0xff] (!%p848_p4) }
  0xa2   : > { %v972_v9 = vpack.c.bf16 (!%p848_p4), %v383_v7, %v382_v6  ;;  %372 = vadd.xlane.f32.xlu0 (!%p848_p4), %v370_v4  ;;  %v976_v13 = vpack.c.bf16 (!%p848_p4), %v385_v12, %v384_v11  ;;  %v386_v14 = vld [vmem:[#allocation11 + $0x30] sm:$0xff] (!%p848_p4)  ;;  %v387_v15 = vld [vmem:[#allocation11 + $0x38] sm:$0xff] (!%p848_p4)  ;;  %v388_v17 = vld [vmem:[#allocation11 + $0x40] sm:$0xff] (!%p848_p4) }
  0xa3   : > { %969 = vmatprep.subr.bf16.mxu0 (!%p848_p4), %v968_v8  ;;  %v980_v16 = vpack.c.bf16 (!%p848_p4), %v387_v15, %v386_v14  ;;  %v389_v18 = vld [vmem:[#allocation11 + $0x48] sm:$0xff] (!%p848_p4)  ;;  %v390_v20 = vld [vmem:[#allocation11 + $0x50] sm:$0xff] (!%p848_p4)  ;;  %v391_v21 = vld [vmem:[#allocation11 + $0x58] sm:$0xff] (!%p848_p4) }
  0xa4   : > { %971 = vmatpush3.bf16.msra.mxu0 (!%p848_p4), %v968_v8  ;;  %v984_v19 = vpack.c.bf16 (!%p848_p4), %v389_v18, %v388_v17  ;;  %v988_v22 = vpack.c.bf16 (!%p848_p4), %v391_v21, %v390_v20  ;;  %v392_v23 = vld [vmem:[#allocation11 + $0x60] sm:$0xff] (!%p848_p4)  ;;  %v393_v24 = vld [vmem:[#allocation11 + $0x68] sm:$0xff] (!%p848_p4)  ;;  %v394_v26 = vld [vmem:[#allocation11 + $0x70] sm:$0xff] (!%p848_p4) }
  0xa5   : > { %973 = vmatprep.subr.bf16.mxu0 (!%p848_p4), %v972_v9  ;;  %v992_v25 = vpack.c.bf16 (!%p848_p4), %v393_v24, %v392_v23  ;;  %v395_v27 = vld [vmem:[#allocation11 + $0x78] sm:$0xff] (!%p848_p4) }
  0xa6   : > { %374 = vadd.xlane.f32.xlu0 (!%p848_p4), %v371_v10  ;;  %v996_v28 = vpack.c.bf16 (!%p848_p4), %v395_v27, %v394_v26  ;;  %v474_v50 = vld [vmem:[#allocation4] sm:$0x1] (!%p848_p4)  ;;  %v484_v53 = vld [vmem:[#allocation5] sm:$0x1] (!%p848_p4) }
  0xa8   : > { %975 = vmatpush3.bf16.msra.mxu0 %v972_v9 }
  0xa9   : > { %977 = vmatprep.subr.bf16.mxu0 %v976_v13 }
  0xac   : > { %979 = vmatpush3.bf16.msra.mxu0 %v976_v13 }
  0xad   : > { %981 = vmatprep.subr.bf16.mxu0 %v980_v16 }
  0xb0   : > { %983 = vmatpush3.bf16.msra.mxu0 %v980_v16 }
  0xb1   : > { %985 = vmatprep.subr.bf16.mxu0 %v984_v19 }
  0xb4   : > { %987 = vmatpush3.bf16.msra.mxu0 %v984_v19 }
  0xb5   : > { %989 = vmatprep.subr.bf16.mxu0 %v988_v22 }
  0xb8   : > { %991 = vmatpush3.bf16.msra.mxu0 %v988_v22 }
  0xb9   : > { %993 = vmatprep.subr.bf16.mxu0 %v992_v25 }
  0xbc   : > { %995 = vmatpush3.bf16.msra.mxu0 %v992_v25 }
  0xbd   : > { %997 = vmatprep.subr.bf16.mxu0 %v996_v28 }
  0xc0   : > { %999 = vmatpush3.bf16.msra.mxu0 %v996_v28 }
 0x12f   : > { %v373_v29 = vpop.xlane.xlu0 %372 }
 0x130   : > { %1160 = vrsqrt.f32 %v373_v29 }
 0x133   : > { %v375_v30 = vpop.xlane.xlu0 %374 }
 0x134   : > { %1162 = vrsqrt.f32 %v375_v30 }
 0x13a   : > { %v1161_v31 = vpop.eup %1160 }
 0x13b   : > { %v378_v32 = vmul.f32 %v1161_v31, %v368_v1 }
 0x13d   : > { %930 = vmatprep.mubr.f32.mxu0 %v378_v32 }
 0x13e   : > { %v1163_v33 = vpop.eup %1162 }
 0x13f   : > { %v379_v34 = vmul.f32 %v1163_v33, %v369_v2 }
 0x141   : > { %931 = vmatmul.mubr.f32.vlgmr.msra.gmra.mrb[0].mxu0 %v379_v34 }
 0x214   : > { %v932_v35 = vpop.f32.mrb[0].mxu0 }
 0x215   : > { %v486_v36 = vmul.f32 %v932_v35, %v932_v35  ;;  %v462_v37 = vpop.f32.mrb[1].mxu0  ;;  %473 = vst [vmem:[%s471_s14 + $0x8] sm:$0xff] %v932_v35 }
 0x216   : > { %472 = vst [vmem:[%s471_s14] sm:$0xff] %v462_v37  ;;  %v475_v38 = vadd.f32 %v932_v35, %v462_v37  ;;  %v485_v39 = vmul.f32 %v462_v37, %v462_v37 }
 0x218   : > { %v476_v40 = vrot.slane %v475_v38, 4  ;;  %v487_v41 = vadd.f32 %v486_v36, %v485_v39 }
 0x21a   : > { %v477_v42 = vadd.f32 %v476_v40, %v475_v38  ;;  %v488_v43 = vrot.slane %v487_v41, 4 }
 0x21c   : > { %v478_v44 = vrot.slane %v477_v42, 2  ;;  %v489_v45 = vadd.f32 %v488_v43, %v487_v41 }
 0x21e   : > { %v479_v46 = vadd.f32 %v478_v44, %v477_v42  ;;  %v490_v47 = vrot.slane %v489_v45, 2 }
 0x220   : > { %v480_v48 = vrot.slane %v479_v46, 1  ;;  %v491_v49 = vadd.f32 %v490_v47, %v489_v45 }
 0x222   : > { %v481_v51 = vadd.f32 %v480_v48, %v479_v46  ;;  %v492_v52 = vrot.slane %v491_v49, 1 }
 0x224   : > { %v482_v54 = vadd.f32 %v481_v51, %v474_v50  ;;  %v493_v55 = vadd.f32 %v492_v52, %v491_v49 }
 0x226   : > { %483 = vst [vmem:[#allocation4] sm:$0x1] %v482_v54  ;;  %v494_v56 = vadd.f32 %v493_v55, %v484_v53 }
 0x228   : > { %495 = vst [vmem:[#allocation5] sm:$0x1] %v494_v56 }
 0x229 PF: > { %p496_p5 = scmp.eq.s32.totalorder %s1368_s8, 1 }
 0x22b   : > { %p497_p6 = pnand %p496_p5, %p356_p13 }
 0x22c   : > { %v508_v1 = vld [vmem:[%s1786_s2] sm:$0x1] (!%p497_p6)  ;;  %s1833_s23 = sld [smem:[#allocation24_spill]] (!%p497_p6) }
 0x22d   : > { %500 = sbr.rel (%p497_p6) target bundleno = 586 (0x24a), region = 72  ;;  %v501_v57 = vld [vmem:[#allocation4] sm:$0x1] (!%p497_p6) }
 0x22e   : > { %v502_v59 = vmul.f32 (!%p497_p6), 0.020833334, %v501_v57 }
 0x22f   : > { %v503_v58 = vld [vmem:[#allocation5] sm:$0x1] (!%p497_p6) }
 0x230   : > { %v504_v60 = vmul.f32 (!%p497_p6), 0.020833334, %v503_v58  ;;  %v505_v61 = vmul.f32 (!%p497_p6), %v502_v59, %v502_v59 }
 0x232   : > { %v506_v62 = vsub.f32 (!%p497_p6), %v504_v60, %v505_v61  ;;  %v513_v4 = vld [vmem:[%s1833_s23] sm:$0x1] (!%p497_p6) }
 0x234   : > { %v507_v63 = vmax.f32 %v506_v62, 0.0 }
 0x236   : > { %v509_v0 = vadd.f32 1e-05, %v507_v63 }
 0x238   : > { %1164 = vrsqrt.f32 %v509_v0 }
 0x242   : > { %v1165_v2 = vpop.eup %1164 }
 0x243   : > { %v511_v3 = vmul.f32 %v1165_v2, %v508_v1 }
 0x245   : > { %512 = vst [vmem:[#allocation4] sm:$0x1] %v511_v3  ;;  %v514_v5 = vmul.f32 %v511_v3, %v502_v59 }
 0x247   : > { %v515_v6 = vsub.f32 %v513_v4, %v514_v5 }
 0x249   : > { %516 = vst [vmem:[#allocation5] sm:$0x1] %v515_v6 }
 0x24a PF: > { %p849_p8 = scmp.ne.s32.totalorder %s1368_s8, 1 }
 0x24b   : > { %v543_v7 = vld [vmem:[#allocation13] sm:$0xff] (!%p849_p8)  ;;  %v544_v8 = vld [vmem:[#allocation13 + $0x8] sm:$0xff] (!%p849_p8)  ;;  %v545_v9 = vld [vmem:[#allocation13 + $0x10] sm:$0xff] (!%p849_p8)  ;;  %s520_s5 = scalar_lea.vmem (!%p849_p8), [#allocation2], %s1671_s22  ;;  %s634_s6 = scalar_lea.vmem (!%p849_p8), [#allocation3], %s1671_s22 }
 0x24c   : > { %519 = sbr.rel (%p849_p8) target bundleno = 854 (0x356), region = 76  ;;  %v1000_v10 = vpack.c.bf16 (!%p849_p8), %v544_v8, %v543_v7  ;;  %v546_v11 = vld [vmem:[#allocation13 + $0x18] sm:$0xff] (!%p849_p8)  ;;  %v547_v13 = vld [vmem:[#allocation13 + $0x20] sm:$0xff] (!%p849_p8)  ;;  %v548_v14 = vld [vmem:[#allocation13 + $0x28] sm:$0xff] (!%p849_p8) }
 0x24d   : > { %v1004_v12 = vpack.c.bf16 (!%p849_p8), %v546_v11, %v545_v9  ;;  %v1008_v15 = vpack.c.bf16 (!%p849_p8), %v548_v14, %v547_v13  ;;  %v549_v16 = vld [vmem:[#allocation13 + $0x30] sm:$0xff] (!%p849_p8)  ;;  %v521_v17 = vld [vmem:[%s520_s5] sm:$0xff] (!%p849_p8)  ;;  %v552_v25 = vld [vmem:[#allocation13 + $0x48] sm:$0xff] (!%p849_p8) }
 0x24e   : > { %1001 = vmatprep.subr.bf16.mxu0 (!%p849_p8), %v1000_v10  ;;  %v550_v18 = vld [vmem:[#allocation13 + $0x38] sm:$0xff] (!%p849_p8)  ;;  %v551_v24 = vld [vmem:[#allocation13 + $0x40] sm:$0xff] (!%p849_p8)  ;;  %v553_v28 = vld [vmem:[#allocation13 + $0x50] sm:$0xff] (!%p849_p8) }
 0x24f   : > { %1003 = vmatpush3.bf16.msra.mxu0 (!%p849_p8), %v1000_v10  ;;  %v850_v19 = vld [vmem:[#allocation4] ss:$0 sm:$0xff] (!%p849_p8)  ;;  %v1012_v22 = vpack.c.bf16 (!%p849_p8), %v550_v18, %v549_v16  ;;  %v1016_v27 = vpack.c.bf16 (!%p849_p8), %v552_v25, %v551_v24  ;;  %v555_v31 = vld [vmem:[#allocation13 + $0x60] sm:$0xff] (!%p849_p8)  ;;  %v556_v32 = vld [vmem:[#allocation13 + $0x68] sm:$0xff] (!%p849_p8) }
 0x250   : > { %1005 = vmatprep.subr.bf16.mxu0 (!%p849_p8), %v1004_v12  ;;  %v851_v20 = vld [vmem:[#allocation5] ss:$0 sm:$0xff] (!%p849_p8)  ;;  %v530_v21 = vmul.f32 (!%p849_p8), %v850_v19, %v521_v17  ;;  %v522_v33 = vld [vmem:[%s520_s5 + $0x8] sm:$0xff] (!%p849_p8)  ;;  %v1024_v34 = vpack.c.bf16 (!%p849_p8), %v556_v32, %v555_v31  ;;  %v557_v35 = vld [vmem:[#allocation13 + $0x70] sm:$0xff] (!%p849_p8) }
 0x251   : > { %v554_v29 = vld [vmem:[#allocation13 + $0x58] sm:$0xff] (!%p849_p8)  ;;  %v531_v37 = vmul.f32 (!%p849_p8), %v850_v19, %v522_v33 }
 0x252   : > { %v539_v23 = vadd.f32 (!%p849_p8), %v851_v20, %v530_v21  ;;  %v1020_v30 = vpack.c.bf16 (!%p849_p8), %v554_v29, %v553_v28  ;;  %v558_v36 = vld [vmem:[#allocation13 + $0x78] sm:$0xff] (!%p849_p8) }
 0x253   : > { %1007 = vmatpush3.bf16.msra.mxu0 %v1004_v12  ;;  %v1028_v38 = vpack.c.bf16 %v558_v36, %v557_v35  ;;  %v540_v39 = vadd.f32 %v851_v20, %v531_v37  ;;  %v637_v56 = vld [vmem:[#allocation6] sm:$0x1]  ;;  %v647_v59 = vld [vmem:[#allocation7] sm:$0x1] }
 0x254   : > { %1009 = vmatprep.subr.bf16.mxu0 %v1008_v15  ;;  %v541_v26 = vmax.f32 %v539_v23, 0.0 }
 0x255   : > { %v542_v40 = vmax.f32 %v540_v39, 0.0 }
 0x256   : > { %965 = vmatprep.mubr.f32.mxu0 %v541_v26 }
 0x257   : > { %1011 = vmatpush3.bf16.msra.mxu0 %v1008_v15 }
 0x258   : > { %1013 = vmatprep.subr.bf16.mxu0 %v1012_v22 }
 0x25b   : > { %1015 = vmatpush3.bf16.msra.mxu0 %v1012_v22 }
 0x25c   : > { %1017 = vmatprep.subr.bf16.mxu0 %v1016_v27 }
 0x25f   : > { %1019 = vmatpush3.bf16.msra.mxu0 %v1016_v27 }
 0x260   : > { %1021 = vmatprep.subr.bf16.mxu0 %v1020_v30 }
 0x263   : > { %1023 = vmatpush3.bf16.msra.mxu0 %v1020_v30 }
 0x264   : > { %1025 = vmatprep.subr.bf16.mxu0 %v1024_v34 }
 0x267   : > { %1027 = vmatpush3.bf16.msra.mxu0 %v1024_v34 }
 0x268   : > { %1029 = vmatprep.subr.bf16.mxu0 %v1028_v38 }
 0x26b   : > { %1031 = vmatpush3.bf16.msra.mxu0 %v1028_v38 }
 0x26e   : > { %966 = vmatmul.mubr.f32.vlgmr.msra.gmra.mrb[0].mxu0 %v542_v40 }
 0x341   : > { %v967_v41 = vpop.f32.mrb[0].mxu0 }
 0x342   : > { %v649_v42 = vmul.f32 %v967_v41, %v967_v41  ;;  %v625_v43 = vpop.f32.mrb[1].mxu0  ;;  %636 = vst [vmem:[%s634_s6 + $0x8] sm:$0xff] %v967_v41 }
 0x343   : > { %635 = vst [vmem:[%s634_s6] sm:$0xff] %v625_v43  ;;  %v638_v44 = vadd.f32 %v967_v41, %v625_v43  ;;  %v648_v45 = vmul.f32 %v625_v43, %v625_v43 }
 0x345   : > { %v639_v46 = vrot.slane %v638_v44, 4  ;;  %v650_v47 = vadd.f32 %v649_v42, %v648_v45 }
 0x347   : > { %v640_v48 = vadd.f32 %v639_v46, %v638_v44  ;;  %v651_v49 = vrot.slane %v650_v47, 4 }
 0x349   : > { %v641_v50 = vrot.slane %v640_v48, 2  ;;  %v652_v51 = vadd.f32 %v651_v49, %v650_v47 }
 0x34b   : > { %v642_v52 = vadd.f32 %v641_v50, %v640_v48  ;;  %v653_v53 = vrot.slane %v652_v51, 2 }
 0x34d   : > { %v643_v54 = vrot.slane %v642_v52, 1  ;;  %v654_v55 = vadd.f32 %v653_v53, %v652_v51 }
 0x34f   : > { %v644_v57 = vadd.f32 %v643_v54, %v642_v52  ;;  %v655_v58 = vrot.slane %v654_v55, 1 }
 0x351   : > { %v645_v60 = vadd.f32 %v644_v57, %v637_v56  ;;  %v656_v61 = vadd.f32 %v655_v58, %v654_v55 }
 0x353   : > { %646 = vst [vmem:[#allocation6] sm:$0x1] %v645_v60  ;;  %v657_v62 = vadd.f32 %v656_v61, %v647_v59 }
 0x355   : > { %658 = vst [vmem:[#allocation7] sm:$0x1] %v657_v62 }
 0x356 PF: > { %p659_p12 = scmp.eq.s32.totalorder %s1368_s8, 2 }
 0x358   : > { %p660_p1 = pnand %p659_p12, %p356_p13 }
 0x359   : > { %s1834_s4 = sld [smem:[#allocation26_spill]] (!%p660_p1)  ;;  %s1835_s27 = sld [smem:[#allocation27_spill]] (!%p660_p1) }
 0x35a   : > { %663 = sbr.rel (%p660_p1) target bundleno = 887 (0x377), region = 80  ;;  %v664_v63 = vld [vmem:[#allocation6] sm:$0x1] (!%p660_p1) }
 0x35b   : > { %v665_v1 = vmul.f32 (!%p660_p1), 0.020833334, %v664_v63 }
 0x35c   : > { %v666_v0 = vld [vmem:[#allocation7] sm:$0x1] (!%p660_p1) }
 0x35d   : > { %v667_v2 = vmul.f32 (!%p660_p1), 0.020833334, %v666_v0  ;;  %v668_v3 = vmul.f32 (!%p660_p1), %v665_v1, %v665_v1 }
 0x35f   : > { %v669_v4 = vsub.f32 (!%p660_p1), %v667_v2, %v668_v3  ;;  %v671_v7 = vld [vmem:[%s1834_s4] sm:$0x1] (!%p660_p1) }
 0x360   : > { %v676_v10 = vld [vmem:[%s1835_s27] sm:$0x1] (!%p660_p1) }
 0x361   : > { %v670_v5 = vmax.f32 %v669_v4, 0.0 }
 0x363   : > { %v672_v6 = vadd.f32 1e-05, %v670_v5 }
 0x365   : > { %1166 = vrsqrt.f32 %v672_v6 }
 0x36f   : > { %v1167_v8 = vpop.eup %1166 }
 0x370   : > { %v674_v9 = vmul.f32 %v1167_v8, %v671_v7 }
 0x372   : > { %675 = vst [vmem:[#allocation6] sm:$0x1] %v674_v9  ;;  %v677_v11 = vmul.f32 %v674_v9, %v665_v1 }
 0x374   : > { %v678_v12 = vsub.f32 %v676_v10, %v677_v11 }
 0x376   : > { %679 = vst [vmem:[#allocation7] sm:$0x1] %v678_v12 }
 0x377 PF: > { %p852_p7 = scmp.ne.s32.totalorder %s1368_s8, 2 }
 0x378   : > { %s683_s21 = scalar_lea.vmem (!%p852_p7), [#allocation3], %s1671_s22 }
 0x379   : > { %682 = sbr.rel (%p852_p7) target bundleno = 897 (0x381), region = 84  ;;  %v853_v13 = vld [vmem:[#allocation6] ss:$0 sm:$0xff] (!%p852_p7)  ;;  %v685_v16 = vld [vmem:[%s683_s21 + $0x8] sm:$0xff] (!%p852_p7) }
 0x37a   : > { %v684_v14 = vld [vmem:[%s683_s21] sm:$0xff] (!%p852_p7)  ;;  %v694_v18 = vmul.f32 (!%p852_p7), %v853_v13, %v685_v16 }
 0x37b   : > { %v693_v17 = vmul.f32 (!%p852_p7), %v853_v13, %v684_v14 }
 0x37d   : > { %v854_v15 = vld [vmem:[#allocation7] ss:$0 sm:$0xff] (!%p852_p7) }
 0x37e   : > { %v702_v19 = vadd.f32 (!%p852_p7), %v854_v15, %v693_v17  ;;  %v703_v20 = vadd.f32 (!%p852_p7), %v854_v15, %v694_v18 }
 0x380   : > { %704 = vst [vmem:[%s1679_s16] sm:$0xff] %v702_v19  ;;  %705 = vst [vmem:[%s1679_s16 + $0x8] sm:$0xff] %v703_v20 }
 0x381 PF: > { %s1836_s14 = sld [smem:[#allocation20_spill]]  ;;  %s722_s7 = sshll.u32 %s1679_s16, 4  ;;  %s1714_s7 = int_to_ptr.vmem [resolvable:$true] %s722_s7 }
 0x382   : > { %s1859_s30 = smov (!%p659_p12, %s1364_s30), 0  ;;  %s1837_s15 = sld [smem:[#allocation28_spill]] }
 0x383   : > { %s861_s22 = sshll.u32 %s1859_s30, 8  ;;  %s1723_s5 = scalar_lea.sflag [#allocation10], %s345_s19 }
 0x384   : > { %s1254_s6 = scalar_lea.vmem %s1714_s7, 256  ;;  %s1388_s8 = smov [#allocation14]  }
 0x385   : > { %p1255_p9 = scmp.ne.s32.totalorder %s1714_s7, %s1254_s6  ;;  %s1258_s16 = sshll.u32 %s1388_s8, 4  ;;  %s1259_s16 = int_to_ptr.vmem [resolvable:$false] %s1258_s16 }
 0x386   : > { %s1260_s20 = scalar_lea.vmem %s1259_s16, 512  ;;  %p1261_p10 = scmp.lt.s32.totalorder %s1714_s7, %s1259_s16 }
 0x387   : > { %p1838_p2 = scmp.ne.s32.totalorder %s1836_s14, 0  ;;  %p1262_p13 = scmp.lt.s32.totalorder %s1260_s20, %s1254_s6 }
 0x388   : > { %s1719_s23 = scalar_lea.hbm %s1837_s15, %s861_s22 }
 0x389   : > { %p1256_p3 = pnand %p1255_p9, %p1838_p2  ;;  %p1263_p0 = por %p1262_p13, %p1261_p10 }
 0x38b   : > { %p1257_p11 = pneg %p1256_p3 }
 0x38d   : > { %p1264_p4 = pnand %p1263_p0, %p1257_p11 }
 0x38f   : > { %1267 = shalt.err (!%p1264_p4)
}
 0x390   : > { %s1268_s30 = scalar_lea.hbm %s1719_s23, 256  ;;  %s1272_s4 = scalar_lea.hbm %s1837_s15, 768 }
 0x391   : > { %p1269_p5 = scmp.ne.s32.totalorder %s1719_s23, %s1268_s30  ;;  %p1273_p12 = scmp.lt.u32.totalorder %s1719_s23, %s1837_s15 }
 0x392   : > { %p1274_p1 = scmp.lt.u32.totalorder %s1272_s4, %s1268_s30  ;;  %p1276_p9 = scmp.lt.u32.totalorder %s1268_s30, %s1719_s23 }
 0x393   : > { %p1270_p6 = pnand %p1269_p5, %p1838_p2 }
 0x394   : > { %p1275_p7 = por %p1274_p1, %p1273_p12 }
 0x395   : > { %p1271_p8 = pneg %p1270_p6 }
 0x396   : > { %p1277_p3 = por %p1276_p9, %p1275_p7 }
 0x398   : > { %p1278_p11 = pnand %p1277_p3, %p1271_p8 }
 0x39a   : > { %1281 = shalt.err (!%p1278_p11)
}
 0x39b   : > { %s1389_s27 = smov 128   ;;  %s1390_s21 = smov 8  }
 0x39c   : > { %1042 = dma.vmem_to_hbm [thread:$0]  (%p1838_p2), %s1714_s7, 256, %s1719_s23, %s1723_s5, %s1389_s27, %s1389_s27, %s1390_s21  }
 0x39d PF: > { %s1839_s22 = sld [smem:[#allocation18_spill]]  ;;  %s1840_s12 = sld [smem:[#allocation21_spill]] }
 0x39e   : > { %p1064_p10 = scmp.ge.s32.totalorder %s1380_s11, 2 }
 0x3a3   : > { %s737_s13 = sand.u32 1, %s1839_s22   ;;  %p1841_p13 = scmp.ne.s32.totalorder %s1840_s12, 0 }
 0x3a4   : > { %s738_s6 = scalar_lea.sflag [#allocation10], %s737_s13 }
 0x3a5   : > { %p1056_p0 = pnand %p1064_p10, %p1841_p13 }
 0x3a7   : > { %1335 = dma.done.wait (!%p1056_p0), %s738_s6, 256  }
 0x3a8   : > { %1337 = vsyncadd (!%p1056_p0), %s738_s6, 4294967040  ;;  %s24_s11 = sadd.s32 1, %s1380_s11   ;;  %s1842_s8 = sld [smem:[#allocation19_spill]] }
 0x3a9   : > { %p21_p4 = scmp.ge.s32.totalorder %s24_s11, 11   ;;  %s1843_s10 = sld [smem:[#allocation22_spill]] }
 0x3aa   : > { %s1844_s24 = smov %s1344_s25  ;;  %s1845_s25 = smov %s1348_s26 }
 0x3ab   : > { %s1846_s26 = smov %s1610_s1  ;;  %s1847_s27 = smov %s1356_s28 }
 0x3ac   : > { %s1848_s28 = smov %s1360_s29  ;;  %s1849_s29 = smov %s1605_s18 }
 0x3ad   : > { %s1850_s30 = smov %s1372_s9  ;;  %s1851_s9 = smov %s1853_s17 }
 0x3ae   :  { %23 = sbr.rel (!%p21_p4) target bundleno = 17 (0x11), region = 129 }
 0x3b5   :  { %743 = vsyncpa [#allocation9], 1 }
 0x3b6   :  { %745 = vsyncpa [#allocation9 + $0x1], 1 }
 0x3b7   :  { %746 = vsyncpa [#allocation12], 1 }
 0x3b8   :  { %747 = vsyncpa [#allocation10], 1 }
 0x3b9   :  { %749 = vsyncpa [#allocation10 + $0x1], 1 }

</bundles_post_ra>
